<compile_context>
chip_gen: v7x
topology: tpu7x:2x2x1
jax: 0.10.0
libtpu: 0.0.40
codegen_flags: <defaults>
</compile_context>

<pallas_src>
import functools
import math

import jax
import jax.numpy as jnp
from jax import lax
from jax.experimental import pallas as pl
from jax.experimental.pallas import tpu as pltpu


def _round_up(x, m):
    return (x + m - 1) // m * m


# ---------------------------------------------------------------------------
# Kernel 1: StdConv2d weight standardization, tiled over rows.
#   Weights are grouped by padded reduction length Kp; rows of one group form
#   a (rows, Kp) slab, cnt holds each row's true K (padding columns are 0).
# ---------------------------------------------------------------------------
def _wstd_kernel(w_ref, cnt_ref, o_ref):
    w = w_ref[...]                                         # (tr, Kp) f32
    cnt = cnt_ref[...]                                     # (tr, 1)  f32
    inv = 1.0 / cnt
    mask = (lax.broadcasted_iota(jnp.int32, w.shape, 1).astype(jnp.float32) < cnt)
    mean = jnp.sum(w, axis=1, keepdims=True) * inv         # padded cols are zero
    d = jnp.where(mask, w - mean, 0.0)
    var = jnp.sum(d * d, axis=1, keepdims=True) * inv      # unbiased=False
    o_ref[...] = ((w - mean) * lax.rsqrt(var + 1e-5)).astype(o_ref.dtype)


def standardize_weights(weights, out_dtype=jnp.bfloat16, tr_max=128):
    """Standardize a list of OIHW conv weights; one row-tiled call per padded-K."""
    results = [None] * len(weights)
    groups = {}
    for idx, w in enumerate(weights):
        cout = w.shape[0]
        k = w.shape[1] * w.shape[2] * w.shape[3]
        kp = _round_up(k, 128)
        groups.setdefault(kp, []).append((idx, w, cout, k))

    for kp, items in groups.items():
        flats = [jnp.pad(w.reshape(c, -1).astype(jnp.float32),
                         ((0, 0), (0, kp - w.reshape(c, -1).shape[1])))
                 for (_, w, c, _) in items]
        cnts = [jnp.full((c, 1), float(k), jnp.float32) for (_, _, c, k) in items]
        wcat = jnp.concatenate(flats, axis=0)
        ccat = jnp.concatenate(cnts, axis=0)
        rows = wcat.shape[0]
        tr = min(tr_max, _round_up(rows, 8))
        rows_p = _round_up(rows, tr)
        if rows_p != rows:
            wcat = jnp.pad(wcat, ((0, rows_p - rows), (0, 0)))
            ccat = jnp.pad(ccat, ((0, rows_p - rows), (0, 0)), constant_values=1.0)

        out = pl.pallas_call(
            _wstd_kernel,
            out_shape=jax.ShapeDtypeStruct((rows_p, kp), out_dtype),
            grid=(rows_p // tr,),
            in_specs=[pl.BlockSpec((tr, kp), lambda r: (r, 0)),
                      pl.BlockSpec((tr, 1), lambda r: (r, 0))],
            out_specs=pl.BlockSpec((tr, kp), lambda r: (r, 0)),
            compiler_params=pltpu.CompilerParams(dimension_semantics=("parallel",)),
        )(wcat, ccat)

        r0 = 0
        for (idx, w, c, k) in items:
            results[idx] = out[r0:r0 + c, :k].reshape(w.shape)
            r0 += c
    return results


# ---------------------------------------------------------------------------
# Kernel 2: tiled matmul (1x1 convs).  bf16 operands, f32 VMEM accumulator,
# K as innermost reduction axis, bf16 output.
# ---------------------------------------------------------------------------
def _matmul_kernel(a_ref, b_ref, o_ref, acc_ref):
    @pl.when(pl.program_id(2) == 0)
    def _():
        acc_ref[...] = jnp.zeros_like(acc_ref)

    acc_ref[...] += jnp.dot(a_ref[...], b_ref[...],
                            preferred_element_type=jnp.float32)

    @pl.when(pl.program_id(2) == pl.num_programs(2) - 1)
    def _():
        o_ref[...] = acc_ref[...].astype(o_ref.dtype)


def pallas_matmul(a, b, *, tm_max=1024, tn_max=512, tk_max=512,
                  out_dtype=jnp.bfloat16):
    """(M,K) @ (K,N) -> (M,N).  bf16 operands, f32 accumulation, bf16 output.
    Footprint ~7 MiB at max tiles (safe on v5e/v6e/v7x scoped defaults)."""
    m, k = a.shape
    _, n = b.shape
    a = a.astype(jnp.bfloat16)
    b = b.astype(jnp.bfloat16)

    tm = min(tm_max, _round_up(m, 16))
    tn = min(tn_max, _round_up(n, 128))
    tk = min(tk_max, _round_up(k, 128))
    mp, np_, kp = _round_up(m, tm), _round_up(n, tn), _round_up(k, tk)

    if (mp, kp) != (m, k):
        a = jnp.pad(a, ((0, mp - m), (0, kp - k)))
    if (kp, np_) != (k, n):
        b = jnp.pad(b, ((0, kp - k), (0, np_ - n)))

    out = pl.pallas_call(
        _matmul_kernel,
        out_shape=jax.ShapeDtypeStruct((mp, np_), out_dtype),
        grid_spec=pltpu.PrefetchScalarGridSpec(
            num_scalar_prefetch=0,
            grid=(mp // tm, np_ // tn, kp // tk),
            in_specs=[pl.BlockSpec((tm, tk), lambda i, j, kk: (i, kk)),
                      pl.BlockSpec((tk, tn), lambda i, j, kk: (kk, j))],
            out_specs=pl.BlockSpec((tm, tn), lambda i, j, kk: (i, j)),
            scratch_shapes=[pltpu.VMEM((tm, tn), jnp.float32)]),
        compiler_params=pltpu.CompilerParams(
            dimension_semantics=("parallel", "parallel", "arbitrary")),
        cost_estimate=pl.CostEstimate(
            flops=2 * mp * np_ * kp, transcendentals=0,
            bytes_accessed=2 * (mp * kp + kp * np_ + mp * np_)),
    )(a, b)

    if (mp, np_) != (m, n):
        out = out[:m, :n]
    return out


# ---------------------------------------------------------------------------
# Kernel 3: fused 3x3 conv (stride 1 or 2, pad 1) without an im2col slab.
#   Glue rearranges the padded NHWC activation into s*s stride-phases (for
#   s=1 this is a no-op reshape); the kernel loops the 9 taps, each tap being
#   a contiguous window slice of its phase, and accumulates bf16 matmuls in
#   f32.  Grid = (batch, output-row tiles); activation/weights stay resident
#   across the row-tile axis.
# ---------------------------------------------------------------------------
def _conv3x3_kernel(x_ref, w_ref, o_ref, *, s, tho, wo):
    j = pl.program_id(1)
    cin = x_ref.shape[-1]
    cout = o_ref.shape[-1]
    acc = jnp.zeros((tho * wo, cout), jnp.float32)
    for kh in range(3):
        for kw in range(3):
            p = (kh % s) * s + (kw % s)
            row0 = j * tho + (kh // s)
            col0 = kw // s
            win = x_ref[p, pl.ds(row0, tho), pl.ds(col0, wo), :]   # (tho, wo, cin)
            acc += jnp.dot(win.reshape(tho * wo, cin), w_ref[kh, kw],
                           preferred_element_type=jnp.float32)
    o_ref[0] = acc.astype(o_ref.dtype)


def pallas_conv3x3(x, w_oihw, stride, out_dtype=jnp.bfloat16):
    """x: (N,H,W,Cin) -> (N, Ho*Wo, Cout), 3x3 conv, pad=1, given stride."""
    n, h, wdt, cin = x.shape
    cout = w_oihw.shape[0]
    s = stride
    ho = (h + 2 - 3) // s + 1
    wo = (wdt + 2 - 3) // s + 1

    # Output-row tile: bound window/accumulator size (~512 KiB f32).
    budget = 1 << 17
    tho = max(1, min(ho, budget // max(1, wo * max(cin, cout))))
    if tho < ho:
        req = 8 // math.gcd(wo, 8)        # output block rows must be 8-aligned
        tho = max(req, (tho // req) * req)
    n_t = -(-ho // tho)
    ho_p = n_t * tho

    off = 2 // s                          # max tap offset within a phase
    hP = ho_p + off
    wP = wo + off

    # Spatial pad (conv pad 1 + alignment for the phase grid), then phase split.
    xp = jnp.pad(x.astype(jnp.bfloat16),
                 ((0, 0), (1, s * hP - h - 1), (1, s * wP - wdt - 1), (0, 0)))
    ph = xp.reshape(n, hP, s, wP, s, cin).transpose(0, 2, 4, 1, 3, 5)
    ph = ph.reshape(n * s * s, hP, wP, cin)

    wmat = jnp.transpose(w_oihw, (2, 3, 1, 0)).astype(jnp.bfloat16)  # (3,3,cin,cout)

    kernel = functools.partial(_conv3x3_kernel, s=s, tho=tho, wo=wo)
    out = pl.pallas_call(
        kernel,
        out_shape=jax.ShapeDtypeStruct((n, ho_p * wo, cout), out_dtype),
        grid_spec=pltpu.PrefetchScalarGridSpec(
            num_scalar_prefetch=0,
            grid=(n, n_t),
            in_specs=[pl.BlockSpec((s * s, hP, wP, cin), lambda b, j: (b, 0, 0, 0)),
                      pl.BlockSpec((3, 3, cin, cout), lambda b, j: (0, 0, 0, 0))],
            out_specs=pl.BlockSpec((1, tho * wo, cout), lambda b, j: (b, j, 0))),
        compiler_params=pltpu.CompilerParams(
            dimension_semantics=("parallel", "parallel")),
        cost_estimate=pl.CostEstimate(
            flops=2 * 9 * n * ho_p * wo * cout * cin, transcendentals=0,
            bytes_accessed=2 * (ph.size + wmat.size + n * ho_p * wo * cout)),
    )(ph, wmat)

    if ho_p != ho:
        out = out.reshape(n, ho_p, wo, cout)[:, :ho].reshape(n, ho * wo, cout)
    return out


# ---------------------------------------------------------------------------
# Kernel 4: fused GroupNorm (+ optional residual, + optional ReLU), HW-tiled.
#   Grid = (N, 2*T): steps 0..T-1 accumulate per-channel sum/sum-sq into a
#   small scratch; step T reduces to per-group stats and precombines
#   scale/shift; steps T..2T-1 apply y = x*scale + shift (+res, ReLU).
#   Zero-padded HW rows contribute nothing to the sums (divide by true count).
# ---------------------------------------------------------------------------
def _gn_kernel(*refs, T, count, eps, relu, has_residual, per_channel):
    idx = 0
    x_ref = refs[idx]; idx += 1
    gamma_ref = refs[idx]; idx += 1
    beta_ref = refs[idx]; idx += 1
    gmat_ref = None
    if not per_channel:
        gmat_ref = refs[idx]; idx += 1
    res_ref = None
    if has_residual:
        res_ref = refs[idx]; idx += 1
    o_ref = refs[idx]; idx += 1
    sum_ref, sq_ref, scale_ref, shift_ref = refs[idx:idx + 4]

    j = pl.program_id(1)

    @pl.when(j == 0)
    def _():
        sum_ref[...] = jnp.zeros_like(sum_ref)
        sq_ref[...] = jnp.zeros_like(sq_ref)

    @pl.when(j < T)
    def _():
        x = x_ref[0].astype(jnp.float32)                    # (thw, C)
        sum_ref[...] += jnp.sum(x, axis=0, keepdims=True)
        sq_ref[...] += jnp.sum(x * x, axis=0, keepdims=True)

    @pl.when(j == T)
    def _():
        inv_cnt = 1.0 / count
        s1 = sum_ref[...]
        s2 = sq_ref[...]
        if per_channel:
            mean = s1 * inv_cnt
            var = s2 * inv_cnt - mean * mean
        else:
            gmat = gmat_ref[...]                            # (C, G) 0/1 membership
            gm = jnp.dot(s1, gmat, preferred_element_type=jnp.float32) * inv_cnt
            gv = jnp.dot(s2, gmat, preferred_element_type=jnp.float32) * inv_cnt
            gv = gv - gm * gm
            mean = lax.dot_general(gm, gmat, (((1,), (1,)), ((), ())),
                                   preferred_element_type=jnp.float32)
            var = lax.dot_general(gv, gmat, (((1,), (1,)), ((), ())),
                                  preferred_element_type=jnp.float32)
        scale = lax.rsqrt(var + eps) * gamma_ref[...]
        scale_ref[...] = scale
        shift_ref[...] = beta_ref[...] - mean * scale

    @pl.when(j >= T)
    def _():
        x = x_ref[0].astype(jnp.float32)
        y = x * scale_ref[...] + shift_ref[...]
        if has_residual:
            y = y + res_ref[0].astype(jnp.float32)
        if relu:
            y = jnp.maximum(y, 0.0)
        o_ref[0] = y.astype(o_ref.dtype)


def pallas_groupnorm(x, gamma, beta, num_groups, eps, relu=False, residual=None,
                     out_dtype=jnp.bfloat16):
    # x: (N, HW, C), any float dtype; stats in f32.
    n, hw, c = x.shape
    cg = c // num_groups
    per_channel = (cg == 1)
    gamma2 = gamma.reshape(1, c).astype(jnp.float32)
    beta2 = beta.reshape(1, c).astype(jnp.float32)

    budget = 1 << 17                                       # elems per HW tile
    thw = min(_round_up(hw, 8), max(8, (budget // c) // 8 * 8))
    hw_p = _round_up(hw, thw)
    T = hw_p // thw
    if hw_p != hw:
        x = jnp.pad(x, ((0, 0), (0, hw_p - hw), (0, 0)))
        if residual is not None:
            residual = jnp.pad(residual, ((0, 0), (0, hw_p - hw), (0, 0)))

    in_specs = [pl.BlockSpec((1, thw, c), lambda i, j: (i, j % T, 0)),
                pl.BlockSpec((1, c), lambda i, j: (0, 0)),
                pl.BlockSpec((1, c), lambda i, j: (0, 0))]
    args = [x, gamma2, beta2]
    if not per_channel:
        gmat = (jnp.arange(c)[:, None] // cg ==
                jnp.arange(num_groups)[None, :]).astype(jnp.float32)
        in_specs.append(pl.BlockSpec((c, num_groups), lambda i, j: (0, 0)))
        args.append(gmat)
    if residual is not None:
        in_specs.append(
            pl.BlockSpec((1, thw, c), lambda i, j: (i, jnp.maximum(j - T, 0), 0)))
        args.append(residual)

    kernel = functools.partial(_gn_kernel, T=T, count=float(hw * cg), eps=eps,
                               relu=relu, has_residual=residual is not None,
                               per_channel=per_channel)
    out = pl.pallas_call(
        kernel,
        out_shape=jax.ShapeDtypeStruct((n, hw_p, c), out_dtype),
        grid=(n, 2 * T),
        in_specs=in_specs,
        out_specs=pl.BlockSpec((1, thw, c), lambda i, j: (i, jnp.maximum(j - T, 0), 0)),
        scratch_shapes=[pltpu.VMEM((1, c), jnp.float32)] * 4,
        compiler_params=pltpu.CompilerParams(
            dimension_semantics=("parallel", "arbitrary")),
    )(*args)
    if hw_p != hw:
        out = out[:, :hw, :]
    return out


# ---------------------------------------------------------------------------
# PreActBottleneck forward (glue: layout transposes / phase split; compute:
# Pallas).  All inter-kernel activations travel as bf16; stats/acc in f32.
# ---------------------------------------------------------------------------
def preact_bottleneck_forward(x_nchw, p, stride):
    n, cin, h, w = x_nchw.shape
    cmid = p['conv1_w'].shape[0]
    cout = p['conv3_w'].shape[0]
    x = jnp.transpose(x_nchw, (0, 2, 3, 1)).astype(jnp.float32)      # NHWC
    xb = x.astype(jnp.bfloat16)

    names = ['conv1_w', 'conv2_w', 'conv3_w'] + (['down_w'] if 'down_w' in p else [])
    std = standardize_weights([p[nm] for nm in names])               # bf16
    w1, w2, w3 = std[0], std[1], std[2]
    wd = std[3] if 'down_w' in p else None

    # ---- conv1 (1x1, stride 1) + gn1 + relu ----
    y = pallas_matmul(xb.reshape(n * h * w, cin),
                      jnp.transpose(w1.reshape(cmid, cin)))
    y = pallas_groupnorm(y.reshape(n, h * w, cmid), p['gn1_w'], p['gn1_b'],
                         32, 1e-6, relu=True)

    # ---- conv2 (3x3, stride, pad 1): fused tap loop, no im2col ----
    ho = (h + 2 - 3) // stride + 1
    wo = (w + 2 - 3) // stride + 1
    y = pallas_conv3x3(y.reshape(n, h, w, cmid), w2, stride)         # (n, ho*wo, cmid)
    y = pallas_groupnorm(y, p['gn2_w'], p['gn2_b'], 32, 1e-6, relu=True)

    # ---- conv3 (1x1, stride 1) ----
    y = pallas_matmul(y.reshape(n * ho * wo, cmid),
                      jnp.transpose(w3.reshape(cout, cmid)))

    # ---- residual branch ----
    if wd is not None:
        # TODO(synk): fold the stride-s spatial sampling into the matmul's A
        # BlockSpec (strided pl.ds reads) instead of an XLA strided slice.
        xs = xb[:, ::stride, ::stride, :]
        r = pallas_matmul(xs.reshape(n * ho * wo, cin),
                          jnp.transpose(wd.reshape(cout, cin)))
        r = pallas_groupnorm(r.reshape(n, ho * wo, cout), p['gnp_w'], p['gnp_b'],
                             cout, 1e-5, relu=False)                 # per-channel
    else:
        r = x.reshape(n, h * w, cin)                                 # identity path

    # ---- gn3 + residual add + relu (fused), f32 block output ----
    y = pallas_groupnorm(y.reshape(n, ho * wo, cout), p['gn3_w'], p['gn3_b'],
                         32, 1e-6, relu=True, residual=r, out_dtype=jnp.float32)
    return jnp.transpose(y.reshape(n, ho, wo, cout), (0, 3, 1, 2))   # back to NCHW


# ---------------------------------------------------------------------------
# Pure-JAX reference (bf16 conv operands, f32 accumulation/GN — mirrors the
# kernel's numerics, which in turn mirror the PyTorch module's semantics).
# ---------------------------------------------------------------------------
def _ref_stdconv(x, w, stride, padding):
    m = jnp.mean(w, axis=(1, 2, 3), keepdims=True)
    v = jnp.mean((w - m) ** 2, axis=(1, 2, 3), keepdims=True)
    ws = (w - m) / jnp.sqrt(v + 1e-5)
    return lax.conv_general_dilated(
        x.astype(jnp.bfloat16), ws.astype(jnp.bfloat16),
        (stride, stride), ((padding, padding), (padding, padding)),
        dimension_numbers=("NCHW", "OIHW", "NCHW"),
        preferred_element_type=jnp.float32)


def _ref_gn(x, gamma, beta, groups, eps):
    n, c, h, w = x.shape
    xg = x.reshape(n, groups, c // groups, h, w)
    m = jnp.mean(xg, axis=(2, 3, 4), keepdims=True)
    v = jnp.mean((xg - m) ** 2, axis=(2, 3, 4), keepdims=True)
    xn = ((xg - m) / jnp.sqrt(v + eps)).reshape(n, c, h, w)
    return xn * gamma.reshape(1, c, 1, 1) + beta.reshape(1, c, 1, 1)


def reference_forward(x, p, stride):
    residual = x
    if 'down_w' in p:
        residual = _ref_stdconv(x, p['down_w'], stride, 0)
        residual = _ref_gn(residual, p['gnp_w'], p['gnp_b'], residual.shape[1], 1e-5)
    y = jax.nn.relu(_ref_gn(_ref_stdconv(x, p['conv1_w'], 1, 0),
                            p['gn1_w'], p['gn1_b'], 32, 1e-6))
    y = jax.nn.relu(_ref_gn(_ref_stdconv(y, p['conv2_w'], stride, 1),
                            p['gn2_w'], p['gn2_b'], 32, 1e-6))
    y = _ref_gn(_ref_stdconv(y, p['conv3_w'], 1, 0), p['gn3_w'], p['gn3_b'], 32, 1e-6)
    return jax.nn.relu(residual + y)


# ---------------------------------------------------------------------------
if __name__ == "__main__":
    import numpy as np

    def make_params(key, cin, cout, cmid, downsample):
        ks = jax.random.split(key, 13)
        p = {
            'conv1_w': 0.1 * jax.random.normal(ks[0], (cmid, cin, 1, 1), jnp.float32),
            'conv2_w': 0.1 * jax.random.normal(ks[1], (cmid, cmid, 3, 3), jnp.float32),
            'conv3_w': 0.1 * jax.random.normal(ks[2], (cout, cmid, 1, 1), jnp.float32),
            'gn1_w': 1.0 + 0.1 * jax.random.normal(ks[4], (cmid,), jnp.float32),
            'gn1_b': 0.1 * jax.random.normal(ks[5], (cmid,), jnp.float32),
            'gn2_w': 1.0 + 0.1 * jax.random.normal(ks[6], (cmid,), jnp.float32),
            'gn2_b': 0.1 * jax.random.normal(ks[7], (cmid,), jnp.float32),
            'gn3_w': 1.0 + 0.1 * jax.random.normal(ks[8], (cout,), jnp.float32),
            'gn3_b': 0.1 * jax.random.normal(ks[9], (cout,), jnp.float32),
        }
        if downsample:
            p['down_w'] = 0.1 * jax.random.normal(ks[3], (cout, cin, 1, 1), jnp.float32)
            p['gnp_w'] = 1.0 + 0.1 * jax.random.normal(ks[10], (cout,), jnp.float32)
            p['gnp_b'] = 0.1 * jax.random.normal(ks[11], (cout,), jnp.float32)
        return p

    key = jax.random.PRNGKey(0)
    k1, k2, kx1, kx2 = jax.random.split(key, 4)

    # Case 1: PreActBottleneck(cin=64, cout=128, cmid=32, stride=2) -> projection shortcut.
    N, CIN, COUT, CMID, H, W, STRIDE = 2, 64, 128, 32, 8, 8, 2
    p1 = make_params(k1, CIN, COUT, CMID, downsample=True)
    x1 = jax.random.normal(kx1, (N, CIN, H, W), jnp.float32)
    out1 = jax.block_until_ready(preact_bottleneck_forward(x1, p1, STRIDE))
    ref1 = reference_forward(x1, p1, STRIDE)
    np.testing.assert_allclose(np.asarray(out1), np.asarray(ref1), rtol=2e-2, atol=2e-2)
    assert out1.shape == (N, COUT, H // STRIDE, W // STRIDE)

    # Case 2: PreActBottleneck(cin=64, cout=64, cmid=32, stride=1) -> identity shortcut.
    p2 = make_params(k2, 64, 64, 32, downsample=False)
    x2 = jax.random.normal(kx2, (N, 64, H, W), jnp.float32)
    out2 = jax.block_until_ready(preact_bottleneck_forward(x2, p2, 1))
    ref2 = reference_forward(x2, p2, 1)
    np.testing.assert_allclose(np.asarray(out2), np.asarray(ref2), rtol=2e-2, atol=2e-2)
    assert out2.shape == (N, 64, H, W)

    print("KERNEL_OK")
</pallas_src>

<mosaic_0001>
module attributes {stable_mosaic.version = 11 : i64} {
  func.func @_wstd_kernel(%arg0: i32, %arg1: memref<128x128xf32, #tpu.memory_space<vmem>>, %arg2: memref<128x1xf32, #tpu.memory_space<vmem>>, %arg3: memref<128x128xbf16, #tpu.memory_space<vmem>>) attributes {dimension_semantics = [#tpu.dimension_semantics<parallel>], iteration_bounds = array<i64: 3>, scalar_prefetch = 0 : i64, scratch_operands = 0 : i64, tpu.core_type = #tpu.core_type<tc>, window_params = [{transform_indices = @transform_0, window_bounds = array<i64: 128, 128>}, {transform_indices = @transform_1, window_bounds = array<i64: 128, 1>}, {transform_indices = @transform_2, window_bounds = array<i64: 128, 128>}]} {
    %c0 = arith.constant 0 : index
    %c0_0 = arith.constant 0 : index
    %0 = vector.load %arg1[%c0, %c0_0] : memref<128x128xf32, #tpu.memory_space<vmem>>, vector<128x128xf32>
    %c0_1 = arith.constant 0 : index
    %c0_2 = arith.constant 0 : index
    %1 = vector.load %arg2[%c0_1, %c0_2] : memref<128x1xf32, #tpu.memory_space<vmem>>, vector<128x1xf32>
    %cst = arith.constant 1.000000e+00 : f32
    %2 = vector.broadcast %cst : f32 to vector<128x1xf32>
    %3 = arith.divf %2, %1 : vector<128x1xf32>
    %4 = tpu.iota {dimensions = array<i32: 1>} : vector<128x128xi32>
    %5 = arith.sitofp %4 : vector<128x128xi32> to vector<128x128xf32>
    %6 = vector.broadcast %1 : vector<128x1xf32> to vector<128x128xf32>
    %7 = arith.cmpf olt, %5, %6 : vector<128x128xf32>
    %cst_3 = arith.constant dense<0.000000e+00> : vector<128xf32>
    %8 = vector.multi_reduction <add>, %0, %cst_3 [1] : vector<128x128xf32> to vector<128xf32>
    %9 = vector.shape_cast %8 : vector<128xf32> to vector<128x1xf32>
    %10 = arith.mulf %9, %3 : vector<128x1xf32>
    %11 = vector.broadcast %10 : vector<128x1xf32> to vector<128x128xf32>
    %12 = arith.subf %0, %11 : vector<128x128xf32>
    %cst_4 = arith.constant 0.000000e+00 : f32
    %13 = vector.broadcast %cst_4 : f32 to vector<128x128xf32>
    %14 = arith.select %7, %12, %13 : vector<128x128xi1>, vector<128x128xf32>
    %15 = arith.mulf %14, %14 : vector<128x128xf32>
    %cst_5 = arith.constant dense<0.000000e+00> : vector<128xf32>
    %16 = vector.multi_reduction <add>, %15, %cst_5 [1] : vector<128x128xf32> to vector<128xf32>
    %17 = vector.shape_cast %16 : vector<128xf32> to vector<128x1xf32>
    %18 = arith.mulf %17, %3 : vector<128x1xf32>
    %19 = vector.broadcast %10 : vector<128x1xf32> to vector<128x128xf32>
    %20 = arith.subf %0, %19 : vector<128x128xf32>
    %cst_6 = arith.constant 9.99999974E-6 : f32
    %21 = vector.broadcast %cst_6 : f32 to vector<128x1xf32>
    %22 = arith.addf %18, %21 : vector<128x1xf32>
    %23 = math.rsqrt %22 : vector<128x1xf32>
    %24 = vector.broadcast %23 : vector<128x1xf32> to vector<128x128xf32>
    %25 = arith.mulf %20, %24 : vector<128x128xf32>
    %26 = arith.truncf %25 : vector<128x128xf32> to vector<128x128xbf16>
    %c0_7 = arith.constant 0 : index
    %c0_8 = arith.constant 0 : index
    %27 = vector.load %arg3[%c0_7, %c0_8] : memref<128x128xbf16, #tpu.memory_space<vmem>>, vector<128x128xbf16>
    tpu.vector_store %arg3[%c0_7, %c0_8], %26 {strides = array<i32>} : memref<128x128xbf16, #tpu.memory_space<vmem>>, vector<128x128xbf16>,
    return
  }
  func.func @transform_0(%arg0: i32) -> (i32, i32) {
    %c0_i32 = arith.constant 0 : i32
    %c0_i32_0 = arith.constant 0 : i32
    return %arg0, %c0_i32 : i32, i32
  }
  func.func @transform_1(%arg0: i32) -> (i32, i32) {
    %c0_i32 = arith.constant 0 : i32
    %c0_i32_0 = arith.constant 0 : i32
    return %arg0, %c0_i32 : i32, i32
  }
  func.func @transform_2(%arg0: i32) -> (i32, i32) {
    %c0_i32 = arith.constant 0 : i32
    %c0_i32_0 = arith.constant 0 : i32
    return %arg0, %c0_i32 : i32, i32
  }
}

</mosaic_0001>

<bundles_post_ra>
// kernel: tpu_custom_call.1
= control target key start
LH: loop header
LB: loop body
LE: loop exit
PB: predicated region body
PF: predicated region fallthrough
CT: control target
= control target key end

     0   :  { %7 = vsyncpa [#allocation3], 0  ;;  %s1505_s0 = inlined_call_operand.vmem [shape: f32[384,128], index: 0, kind: input, shape index: {}]   ;;  %s1506_s1 = inlined_call_operand.vmem [shape: f32[384,1], index: 1, kind: input, shape index: {}]   ;;  %s1507_s2 = inlined_call_operand.hbm [shape: bf16[384,128], index: 2, kind: output, shape index: {}]  }
   0x1   :  { %9 = vsyncpa [#allocation3 + $0x1], 0  ;;  %s1135_s9 = smov 0   ;;  %s1137_s10 = smov 0  }
   0x2   :  { %s1139_s11 = smov 0   ;;  %s1141_s12 = smov 0  }
   0x3 LB: > { %s1156_s13 = sadd.s32 4294967295, %s1114_s12   ;;  %s850_s14 = sadd.s32 4294967294, %s1114_s12   ;;  %s1114_s12 = sphi %s1141_s12, %s1513_s12   ;;  %s1110_s11 = sphi %s1139_s11, %s1512_s11   ;;  %s1106_s10 = sphi %s1137_s10, %s1511_s10   ;;  %s1102_s9 = sphi %s1135_s9, %s1510_s9  }
   0x4   : > { %s1160_s15 = sadd.s32 1, %s1114_s12   ;;  %s74_s16 = sadd.s32 1, %s1110_s11 }
   0x5   : > { %s71_s17 = ssub.s32 %s1114_s12, %s1160_s15  ;;  %p84_p0 = scmp.ne.s32.totalorder %s1110_s11, %s1106_s10 }
   0x6   : > { %p72_p1 = scmp.eq.s32.totalorder %s71_s17, 0  ;;  %p85_p2 = scmp.eq.s32.totalorder %s1156_s13, 2 }
   0x7   : > { %p90_p3 = scmp.ne.s32.totalorder %s1106_s10, %s1102_s9  ;;  %p91_p4 = scmp.eq.s32.totalorder %s850_s14, 2 }
   0x8   : > { %s1171_s18 = scalar_select %p72_p1, %s1110_s11, %s74_s16  }
   0x9   : > { %p1173_p5 = por %p85_p2, %p84_p0  ;;  %p1177_p6 = por %p91_p4, %p90_p3 }
   0xa   : > { %p853_p7 = scmp.ge.s32.totalorder %s1114_s12, 1  ;;  %p127_p8 = scmp.lt.s32.totalorder %s1114_s12, 4 }
   0xc   : > { %p128_p9 = pnand %p853_p7, %p127_p8 }
   0xd   : > { %s855_s21 = sshll.u32 (!%p128_p9), %s1156_s13, 4  ;;  %v1116_v0 = vmov (!%p128_p9), 0   ;;  %s151_s29 = sand.u32 (!%p128_p9), 1, %s1106_s10  }
   0xe   : > { %131 = sbr.rel (%p128_p9) target bundleno = 638 (0x27e), region = 28  ;;  %p155_p10 = scmp.lt.s32.totalorder (!%p128_p9), %s855_s21, 47  ;;  %986 = vset.pattern.permute.xlu0 (!%p128_p9), %v1116_v0  ;;  %987 = vset.pattern.permute.xlu1 (!%p128_p9), %v1116_v0 }
   0xf   : > { %s854_s30 = sshll.u32 (!%p128_p9), %s151_s29, 6  ;;  %s896_s4 = sshll.u32 (!%p128_p9), %s1156_s13, 10 }
  0x10   : > { %s1429_s3 = scalar_lea.vmem (!%p128_p9), [#allocation2], %s854_s30  ;;  %s1457_s8 = scalar_lea.hbm (!%p128_p9), %s1507_s2, %s896_s4 }
  0x11   : > { %s776_s5 = sshll.u32 (!%p128_p9), %s1429_s3, 4  ;;  %s1464_s13 = scalar_lea.sflag (!%p128_p9), [#allocation3], %s151_s29  ;;  %s1459_s5 = int_to_ptr.vmem [resolvable:$true] %s776_s5 }
  0x12   : > { %s1052_s14 = scalar_lea.vmem (!%p128_p9), %s1459_s5, 1024  ;;  %s1117_s16 = smov (!%p128_p9), [#allocation2]  }
  0x13   : > { %p1053_p11 = scmp.ne.s32.totalorder (!%p128_p9), %s1459_s5, %s1052_s14  ;;  %s1056_s17 = sshll.u32 (!%p128_p9), %s1117_s16, 4  ;;  %s1057_s17 = int_to_ptr.vmem [resolvable:$false] %s1056_s17 }
  0x14   : > { %p1059_p0 = scmp.lt.s32.totalorder (!%p128_p9), %s1459_s5, %s1057_s17 }
  0x15   : > { %s1515_s21 = smov (!%p155_p10, %s855_s21), 47  ;;  %p1054_p12 = pnand %p1053_p11, %p1173_p5 }
  0x16   : > { %s856_s22 = sshll.u32 %s1515_s21, 3  ;;  %s1058_s21 = scalar_lea.vmem %s1057_s17, 2048 }
  0x17   : > { %s158_s25 = scalar_lea.vmem %s1505_s0, %s856_s22  ;;  %s1245_s28 = scalar_lea.vmem %s1506_s1, %s856_s22 }
  0x18   : > { %v1192_v1 = vld [vmem:[%s158_s25 + $0x8] sm:$0xff]  ;;  %v1194_v2 = vld [vmem:[%s158_s25] sm:$0xff]  ;;  %v1198_v3 = vld [vmem:[%s158_s25 + $0x10] sm:$0xff]  ;;  %p1055_p13 = pneg %p1054_p12  ;;  %p1060_p1 = scmp.lt.s32.totalorder %s1058_s21, %s1052_s14 }
  0x19   : > { %332 = vadd.xlane.f32.xlu0 %v1192_v1  ;;  %330 = vadd.xlane.f32.xlu1 %v1194_v2  ;;  %v1200_v4 = vld [vmem:[%s158_s25 + $0x18] sm:$0xff]  ;;  %v1204_v5 = vld [vmem:[%s158_s25 + $0x20] sm:$0xff]  ;;  %v1206_v6 = vld [vmem:[%s158_s25 + $0x28] sm:$0xff] }
  0x1a   : > { %v1210_v7 = vld [vmem:[%s158_s25 + $0x30] sm:$0xff]  ;;  %v1212_v8 = vld [vmem:[%s158_s25 + $0x38] sm:$0xff]  ;;  %v1216_v9 = vld [vmem:[%s158_s25 + $0x40] sm:$0xff]  ;;  %p1061_p2 = por %p1060_p1, %p1059_p0 }
  0x1b   : > { %v1218_v10 = vld [vmem:[%s158_s25 + $0x48] sm:$0xff]  ;;  %v1222_v11 = vld [vmem:[%s158_s25 + $0x50] sm:$0xff]  ;;  %v1224_v12 = vld [vmem:[%s158_s25 + $0x58] sm:$0xff] }
  0x1c   : > { %v1228_v13 = vld [vmem:[%s158_s25 + $0x60] sm:$0xff]  ;;  %v1230_v14 = vld [vmem:[%s158_s25 + $0x68] sm:$0xff]  ;;  %v1234_v15 = vld [vmem:[%s158_s25 + $0x70] sm:$0xff]  ;;  %p1062_p3 = pnand %p1061_p2, %p1055_p13 }
  0x1d   : > { %334 = vadd.xlane.f32.xlu0 %v1198_v3  ;;  %336 = vadd.xlane.f32.xlu1 %v1200_v4  ;;  %v1236_v16 = vld [vmem:[%s158_s25 + $0x78] sm:$0xff]  ;;  %v185_v17 = vld [vmem:[%s1245_s28 + $0x10] sm:$0xff]  ;;  %v183_v19 = vld [vmem:[%s1245_s28] sm:$0xff] }
  0x1e   : > { %v186_v18 = vld [vmem:[%s1245_s28 + $0x18] sm:$0xff]  ;;  %v189_v20 = vld [vmem:[%s1245_s28 + $0x30] sm:$0xff]  ;;  %v184_v21 = vld [vmem:[%s1245_s28 + $0x8] sm:$0xff]  ;;  %988 = vrcp.f32 %v183_v19 }
  0x1f   : > { %v190_v22 = vld [vmem:[%s1245_s28 + $0x38] sm:$0xff]  ;;  %v187_v23 = vld [vmem:[%s1245_s28 + $0x20] sm:$0xff]  ;;  %v192_v24 = vld [vmem:[%s1245_s28 + $0x48] sm:$0xff]  ;;  %990 = vrcp.f32 %v184_v21 }
  0x20   : > { %v188_v25 = vld [vmem:[%s1245_s28 + $0x28] sm:$0xff]  ;;  %v194_v26 = vld [vmem:[%s1245_s28 + $0x58] sm:$0xff]  ;;  %v191_v27 = vld [vmem:[%s1245_s28 + $0x40] sm:$0xff]  ;;  %992 = vrcp.f32 %v185_v17 }
  0x21   : > { %338 = vadd.xlane.f32.xlu0 %v1204_v5  ;;  %340 = vadd.xlane.f32.xlu1 %v1206_v6  ;;  %v196_v28 = vld [vmem:[%s1245_s28 + $0x68] sm:$0xff]  ;;  %v193_v29 = vld [vmem:[%s1245_s28 + $0x50] sm:$0xff]  ;;  %v195_v30 = vld [vmem:[%s1245_s28 + $0x60] sm:$0xff]  ;;  %994 = vrcp.f32 %v186_v18 }
  0x22   : > { %996 = vrcp.f32 %v187_v23  ;;  %v197_v53 = vld [vmem:[%s1245_s28 + $0x70] sm:$0xff]  ;;  %v198_v57 = vld [vmem:[%s1245_s28 + $0x78] sm:$0xff] }
  0x23   : > { %998 = vrcp.f32 %v188_v25 }
  0x24   : > { %1000 = vrcp.f32 %v189_v20 }
  0x25   : > { %342 = vadd.xlane.f32.xlu0 %v1210_v7  ;;  %344 = vadd.xlane.f32.xlu1 %v1212_v8  ;;  %1002 = vrcp.f32 %v190_v22 }
  0x26   : > { %1004 = vrcp.f32 %v191_v27 }
  0x27   : > { %1006 = vrcp.f32 %v192_v24 }
  0x28   : > { %v1261_v31 = vpop.eup %988  ;;  %1008 = vrcp.f32 %v193_v29 }
  0x29   : > { %346 = vadd.xlane.f32.xlu0 %v1216_v9  ;;  %348 = vadd.xlane.f32.xlu1 %v1218_v10  ;;  %v1263_v32 = vpop.eup %990  ;;  %1010 = vrcp.f32 %v194_v26 }
  0x2a   : > { %v1265_v35 = vpop.eup %992  ;;  %1012 = vrcp.f32 %v195_v30 }
  0x2b   : > { %v1269_v38 = vpop.eup %994  ;;  %1014 = vrcp.f32 %v196_v28 }
  0x2c   : > { %v1271_v41 = vpop.eup %996  ;;  %1016 = vrcp.f32 %v197_v53 }
  0x2d   : > { %350 = vadd.xlane.f32.xlu0 %v1222_v11  ;;  %352 = vadd.xlane.f32.xlu1 %v1224_v12  ;;  %v1275_v44 = vpop.eup %998  ;;  %1018 = vrcp.f32 %v198_v57 }
  0x2e   : > { %v1277_v47 = vpop.eup %1000 }
  0x2f   : > { %v1281_v50 = vpop.eup %1002 }
  0x30   : > { %v1284_v54 = vpop.eup %1004 }
  0x31   : > { %354 = vadd.xlane.f32.xlu0 %v1228_v13  ;;  %356 = vadd.xlane.f32.xlu1 %v1230_v14  ;;  %v1289_v58 = vpop.eup %1006 }
  0x32   : > { %v1291_v61 = vpop.eup %1008 }
  0x33   : > { %v1295_v0 = vpop.eup %1010 }
  0x35   : > { %358 = vadd.xlane.f32.xlu0 %v1234_v15  ;;  %360 = vadd.xlane.f32.xlu1 %v1236_v16 }
  0x46   : > { %246 = vperm.xlu1 %987, %v185_v17  }
  0x4a   : > { %251 = vperm.xlu1 %987, %v186_v18  }
  0x4b   : > { %236 = vperm.xlu0 %986, %v183_v19   ;;  %v1297_v19 = vpop.eup %1012 }
  0x4e   : > { %266 = vperm.xlu1 %987, %v189_v20  }
  0x4f   : > { %241 = vperm.xlu0 %986, %v184_v21  }
  0x52   : > { %271 = vperm.xlu1 %987, %v190_v22   ;;  %v1301_v22 = vpop.eup %1014 }
  0x53   : > { %256 = vperm.xlu0 %986, %v187_v23  }
  0x56   : > { %281 = vperm.xlu1 %987, %v192_v24  }
  0x57   : > { %261 = vperm.xlu0 %986, %v188_v25   ;;  %v1303_v25 = vpop.eup %1016 }
  0x5a   : > { %291 = vperm.xlu1 %987, %v194_v26  }
  0x5b   : > { %276 = vperm.xlu0 %986, %v191_v27  }
  0x5e   : > { %301 = vperm.xlu1 %987, %v196_v28   ;;  %v1307_v28 = vpop.eup %1018 }
  0x5f   : > { %286 = vperm.xlu0 %986, %v193_v29  }
  0x63   : > { %296 = vperm.xlu0 %986, %v195_v30  }
  0xa6   : > { %v333_v33 = vpop.xlane.xlu0 %332  ;;  %v331_v34 = vpop.xlane.xlu1 %330 }
  0xa7   : > { %v363_v36 = vmul.f32 %v1263_v32, %v333_v33  ;;  %v362_v37 = vmul.f32 %v1261_v31, %v331_v34 }
  0xa9   : > { %385 = vperm.xlu1 %987, %v363_v36   ;;  %380 = vperm.xlu0 %986, %v362_v37  }
  0xaa   : > { %v335_v39 = vpop.xlane.xlu0 %334  ;;  %v337_v40 = vpop.xlane.xlu1 %336 }
  0xab   : > { %v364_v42 = vmul.f32 %v1265_v35, %v335_v39  ;;  %v365_v43 = vmul.f32 %v1269_v38, %v337_v40 }
  0xad   : > { %390 = vperm.xlu0 %986, %v364_v42   ;;  %395 = vperm.xlu1 %987, %v365_v43  }
  0xae   : > { %v339_v45 = vpop.xlane.xlu0 %338  ;;  %v341_v46 = vpop.xlane.xlu1 %340 }
  0xaf   : > { %v366_v48 = vmul.f32 %v1271_v41, %v339_v45  ;;  %v367_v49 = vmul.f32 %v1275_v44, %v341_v46 }
  0xb1   : > { %400 = vperm.xlu0 %986, %v366_v48   ;;  %405 = vperm.xlu1 %987, %v367_v49  }
  0xb2   : > { %v343_v51 = vpop.xlane.xlu0 %342  ;;  %v345_v52 = vpop.xlane.xlu1 %344 }
  0xb3   : > { %v368_v55 = vmul.f32 %v1277_v47, %v343_v51  ;;  %v369_v56 = vmul.f32 %v1281_v50, %v345_v52  ;;  %v231_v51 = vlaneseq }
  0xb5   : > { %410 = vperm.xlu0 %986, %v368_v55   ;;  %415 = vperm.xlu1 %987, %v369_v56   ;;  %v232_v56 = vand.u32 127, %v231_v51 }
  0xb6   : > { %v347_v59 = vpop.xlane.xlu0 %346  ;;  %v349_v60 = vpop.xlane.xlu1 %348 }
  0xb7   : > { %v370_v62 = vmul.f32 %v1284_v54, %v347_v59  ;;  %v371_v63 = vmul.f32 %v1289_v58, %v349_v60 }
  0xb9   : > { %420 = vperm.xlu0 %986, %v370_v62   ;;  %425 = vperm.xlu1 %987, %v371_v63  }
  0xba   : > { %v351_v17 = vpop.xlane.xlu0 %350  ;;  %v353_v18 = vpop.xlane.xlu1 %352 }
  0xbb   : > { %v372_v20 = vmul.f32 %v1291_v61, %v351_v17  ;;  %v373_v21 = vmul.f32 %v1295_v0, %v353_v18 }
  0xbd   : > { %430 = vperm.xlu0 %986, %v372_v20   ;;  %435 = vperm.xlu1 %987, %v373_v21  }
  0xbe   : > { %v355_v23 = vpop.xlane.xlu0 %354  ;;  %v357_v24 = vpop.xlane.xlu1 %356 }
  0xbf   : > { %v374_v26 = vmul.f32 %v1297_v19, %v355_v23  ;;  %v375_v27 = vmul.f32 %v1301_v22, %v357_v24 }
  0xc1   : > { %440 = vperm.xlu0 %986, %v374_v26   ;;  %445 = vperm.xlu1 %987, %v375_v27  }
  0xc2   : > { %v359_v29 = vpop.xlane.xlu0 %358  ;;  %v361_v30 = vpop.xlane.xlu1 %360 }
  0xc3   : > { %v376_v33 = vmul.f32 %v1303_v25, %v359_v29  ;;  %v377_v34 = vmul.f32 %v1307_v28, %v361_v30 }
  0xc5   : > { %450 = vperm.xlu0 %986, %v376_v33   ;;  %455 = vperm.xlu1 %987, %v377_v34  }
  0xc6   : > { %v247_v37 = vpop.permute.xlu1 %246 }
  0xc9   : > { %306 = vperm.xlu0 %986, %v197_v53   ;;  %311 = vperm.xlu1 %987, %v198_v57   ;;  %v1321_v57 = vcvt.s32.f32 %v232_v56 }
  0xca   : > { %v237_v36 = vpop.permute.xlu0 %236  ;;  %v252_v40 = vpop.permute.xlu1 %251 }
  0xcb   : > { %vm314_vm0 = vcmp.lt.f32.partialorder %v1321_v57, %v237_v36  ;;  %vm316_vm2 = vcmp.lt.f32.partialorder %v1321_v57, %v247_v37  ;;  %vm317_vm3 = vcmp.lt.f32.partialorder %v1321_v57, %v252_v40 }
  0xce   : > { %v242_v39 = vpop.permute.xlu0 %241  ;;  %v267_v43 = vpop.permute.xlu1 %266 }
  0xcf   : > { %vm315_vm1 = vcmp.lt.f32.partialorder %v1321_v57, %v242_v39  ;;  %vm320_vm6 = vcmp.lt.f32.partialorder %v1321_v57, %v267_v43 }
  0xd2   : > { %v257_v42 = vpop.permute.xlu0 %256  ;;  %v272_v46 = vpop.permute.xlu1 %271 }
  0xd3   : > { %vm318_vm4 = vcmp.lt.f32.partialorder %v1321_v57, %v257_v42  ;;  %vm321_vm7 = vcmp.lt.f32.partialorder %v1321_v57, %v272_v46 }
  0xd6   : > { %v262_v45 = vpop.permute.xlu0 %261  ;;  %v1311_v49 = vpop.permute.xlu1 %281 }
  0xd7   : > { %vm319_vm5 = vcmp.lt.f32.partialorder %v1321_v57, %v262_v45  ;;  %vm323_vm9 = vcmp.lt.f32.partialorder %v1321_v57, %v1311_v49 }
  0xda   : > { %v277_v48 = vpop.permute.xlu0 %276  ;;  %v1315_v55 = vpop.permute.xlu1 %291 }
  0xdb   : > { %vm322_vm8 = vcmp.lt.f32.partialorder %v1321_v57, %v277_v48  ;;  %vm325_vm11 = vcmp.lt.f32.partialorder %v1321_v57, %v1315_v55 }
  0xde   : > { %v1313_v52 = vpop.permute.xlu0 %286  ;;  %v1319_v53 = vpop.permute.xlu1 %301 }
  0xdf   : > { %vm324_vm10 = vcmp.lt.f32.partialorder %v1321_v57, %v1313_v52  ;;  %vm327_vm13 = vcmp.lt.f32.partialorder %v1321_v57, %v1319_v53 }
  0xe2   : > { %v1317_v59 = vpop.permute.xlu0 %296 }
  0xe3   : > { %vm326_vm12 = vcmp.lt.f32.partialorder %v1321_v57, %v1317_v59 }
 0x128   : > { %v381_v60 = vpop.permute.xlu0 %380  ;;  %v386_v62 = vpop.permute.xlu1 %385 }
 0x129   : > { %v1324_v63 = vsub.f32 %v1194_v2, %v381_v60  ;;  %v1327_v17 = vsub.f32 %v1192_v1, %v386_v62 }
 0x12b   : > { %v474_v18 = vsel %vm314_vm0, %v1324_v63, 0.0  ;;  %v475_v20 = vsel %vm315_vm1, %v1327_v17, 0.0 }
 0x12c   : > { %v391_v21 = vpop.permute.xlu0 %390  ;;  %v396_v23 = vpop.permute.xlu1 %395  ;;  %v490_v24 = vmul.f32 %v474_v18, %v474_v18  ;;  %v491_v26 = vmul.f32 %v475_v20, %v475_v20 }
 0x12d   : > { %v1334_v27 = vsub.f32 %v1198_v3, %v391_v21  ;;  %v1337_v2 = vsub.f32 %v1200_v4, %v396_v23 }
 0x12e   : > { %506 = vadd.xlane.f32.xlu0 %v490_v24  ;;  %508 = vadd.xlane.f32.xlu1 %v491_v26 }
 0x12f   : > { %v476_v1 = vsel %vm316_vm2, %v1334_v27, 0.0  ;;  %v477_v4 = vsel %vm317_vm3, %v1337_v2, 0.0 }
 0x130   : > { %v401_v29 = vpop.permute.xlu0 %400  ;;  %v406_v30 = vpop.permute.xlu1 %405  ;;  %v492_v33 = vmul.f32 %v476_v1, %v476_v1  ;;  %v493_v51 = vmul.f32 %v477_v4, %v477_v4 }
 0x131   : > { %v1343_v34 = vsub.f32 %v1204_v5, %v401_v29  ;;  %v1346_v3 = vsub.f32 %v1206_v6, %v406_v30 }
 0x132   : > { %510 = vadd.xlane.f32.xlu0 %v492_v33 }
 0x133   : > { %v478_v36 = vsel %vm318_vm4, %v1343_v34, 0.0  ;;  %v479_v6 = vsel %vm319_vm5, %v1346_v3, 0.0 }
 0x134   : > { %v411_v37 = vpop.permute.xlu0 %410  ;;  %v416_v39 = vpop.permute.xlu1 %415  ;;  %v494_v40 = vmul.f32 %v478_v36, %v478_v36  ;;  %v495_v18 = vmul.f32 %v479_v6, %v479_v6 }
 0x135   : > { %v1353_v56 = vsub.f32 %v1210_v7, %v411_v37  ;;  %v1356_v5 = vsub.f32 %v1212_v8, %v416_v39 }
 0x136   : > { %514 = vadd.xlane.f32.xlu1 %v494_v40  ;;  %512 = vadd.xlane.f32.xlu0 %v493_v51 }
 0x137   : > { %v480_v42 = vsel %vm320_vm6, %v1353_v56, 0.0  ;;  %v481_v20 = vsel %vm321_vm7, %v1356_v5, 0.0 }
 0x138   : > { %v421_v45 = vpop.permute.xlu0 %420  ;;  %v426_v60 = vpop.permute.xlu1 %425  ;;  %v496_v62 = vmul.f32 %v480_v42, %v480_v42  ;;  %v497_v24 = vmul.f32 %v481_v20, %v481_v20 }
 0x139   : > { %v1363_v7 = vsub.f32 %v1216_v9, %v421_v45  ;;  %v1366_v8 = vsub.f32 %v1218_v10, %v426_v60 }
 0x13a   : > { %518 = vadd.xlane.f32.xlu1 %v496_v62  ;;  %516 = vadd.xlane.f32.xlu0 %v495_v18 }
 0x13b   : > { %v482_v43 = vsel %vm322_vm8, %v1363_v7, 0.0  ;;  %v483_v26 = vsel %vm323_vm9, %v1366_v8, 0.0 }
 0x13c   : > { %v431_v46 = vpop.permute.xlu0 %430  ;;  %v436_v21 = vpop.permute.xlu1 %435  ;;  %v498_v23 = vmul.f32 %v482_v43, %v482_v43 }
 0x13d   : > { %v1374_v9 = vsub.f32 %v1222_v11, %v431_v46  ;;  %v1377_v10 = vsub.f32 %v1224_v12, %v436_v21  ;;  %v499_v11 = vmul.f32 %v483_v26, %v483_v26 }
 0x13e   : > { %522 = vadd.xlane.f32.xlu1 %v498_v23  ;;  %520 = vadd.xlane.f32.xlu0 %v497_v24 }
 0x13f   : > { %v484_v48 = vsel %vm324_vm10, %v1374_v9, 0.0  ;;  %v485_v33 = vsel %vm325_vm11, %v1377_v10, 0.0 }
 0x140   : > { %v441_v49 = vpop.permute.xlu0 %440  ;;  %v446_v1 = vpop.permute.xlu1 %445  ;;  %v500_v29 = vmul.f32 %v484_v48, %v484_v48 }
 0x141   : > { %v1386_v30 = vsub.f32 %v1228_v13, %v441_v49  ;;  %v1389_v12 = vsub.f32 %v1230_v14, %v446_v1  ;;  %v501_v13 = vmul.f32 %v485_v33, %v485_v33 }
 0x142   : > { %526 = vadd.xlane.f32.xlu1 %v500_v29  ;;  %524 = vadd.xlane.f32.xlu0 %v499_v11 }
 0x143   : > { %v486_v52 = vsel %vm326_vm12, %v1386_v30, 0.0  ;;  %v487_v37 = vsel %vm327_vm13, %v1389_v12, 0.0 }
 0x144   : > { %v451_v55 = vpop.permute.xlu0 %450  ;;  %v456_v4 = vpop.permute.xlu1 %455  ;;  %v502_v36 = vmul.f32 %v486_v52, %v486_v52  ;;  %v503_v51 = vmul.f32 %v487_v37, %v487_v37 }
 0x145   : > { %v1399_v14 = vsub.f32 %v1234_v15, %v451_v55  ;;  %v1402_v59 = vsub.f32 %v1236_v16, %v456_v4 }
 0x146   : > { %530 = vadd.xlane.f32.xlu1 %v502_v36  ;;  %528 = vadd.xlane.f32.xlu0 %v501_v13 }
 0x148   : > { %v307_v39 = vpop.permute.xlu0 %306  ;;  %v312_v40 = vpop.permute.xlu1 %311 }
 0x149   : > { %vm328_vm14 = vcmp.lt.f32.partialorder %v1321_v57, %v307_v39  ;;  %vm329_vm15 = vcmp.lt.f32.partialorder %v1321_v57, %v312_v40 }
 0x14a   : > { %v488_v53 = vsel %vm328_vm14, %v1399_v14, 0.0  ;;  %v489_v6 = vsel %vm329_vm15, %v1402_v59, 0.0  ;;  %532 = vadd.xlane.f32.xlu0 %v503_v51 }
 0x14b   : > { %v504_v42 = vmul.f32 %v488_v53, %v488_v53  ;;  %v505_v45 = vmul.f32 %v489_v6, %v489_v6 }
 0x14d   : > { %534 = vadd.xlane.f32.xlu1 %v504_v42 }
 0x14e   : > { %536 = vadd.xlane.f32.xlu0 %v505_v45 }
 0x1bb   : > { %v507_v15 = vpop.xlane.xlu0 %506  ;;  %v509_v60 = vpop.xlane.xlu1 %508 }
 0x1bc   : > { %v538_v16 = vmul.f32 %v1261_v31, %v507_v15  ;;  %v539_v62 = vmul.f32 %v1263_v32, %v509_v60 }
 0x1be   : > { %v554_v18 = vadd.f32 1e-05, %v538_v16  ;;  %v555_v20 = vadd.f32 1e-05, %v539_v62 }
 0x1bf   : > { %v511_v43 = vpop.xlane.xlu0 %510 }
 0x1c0   : > { %1020 = vrsqrt.f32 %v554_v18  ;;  %v540_v57 = vmul.f32 %v1265_v35, %v511_v43 }
 0x1c1   : > { %1022 = vrsqrt.f32 %v555_v20 }
 0x1c2   : > { %v556_v46 = vadd.f32 1e-05, %v540_v57 }
 0x1c3   : > { %v513_v21 = vpop.xlane.xlu0 %512  ;;  %v515_v23 = vpop.xlane.xlu1 %514 }
 0x1c4   : > { %1024 = vrsqrt.f32 %v556_v46  ;;  %v541_v24 = vmul.f32 %v1269_v38, %v513_v21  ;;  %v542_v26 = vmul.f32 %v1271_v41, %v515_v23 }
 0x1c6   : > { %v557_v48 = vadd.f32 1e-05, %v541_v24  ;;  %v558_v49 = vadd.f32 1e-05, %v542_v26 }
 0x1c7   : > { %v517_v31 = vpop.xlane.xlu0 %516  ;;  %v519_v1 = vpop.xlane.xlu1 %518 }
 0x1c8   : > { %1026 = vrsqrt.f32 %v557_v48  ;;  %v543_v32 = vmul.f32 %v1275_v44, %v517_v31  ;;  %v544_v29 = vmul.f32 %v1277_v47, %v519_v1 }
 0x1c9   : > { %1028 = vrsqrt.f32 %v558_v49 }
 0x1ca   : > { %v1021_v35 = vpop.eup %1020  ;;  %v559_v11 = vadd.f32 1e-05, %v543_v32  ;;  %v560_v33 = vadd.f32 1e-05, %v544_v29 }
 0x1cb   : > { %v1023_v52 = vpop.eup %1022  ;;  %588 = vperm.xlu1 %987, %v1021_v35   ;;  %v521_v55 = vpop.xlane.xlu0 %520 }
 0x1cc   : > { %v523_v4 = vpop.xlane.xlu1 %522  ;;  %1030 = vrsqrt.f32 %v559_v11  ;;  %v545_v38 = vmul.f32 %v1281_v50, %v521_v55  ;;  %593 = vperm.xlu0 %986, %v1023_v52  }
 0x1cd   : > { %v546_v41 = vmul.f32 %v1284_v54, %v523_v4  ;;  %1032 = vrsqrt.f32 %v560_v33 }
 0x1ce   : > { %v1025_v36 = vpop.eup %1024  ;;  %v561_v13 = vadd.f32 1e-05, %v545_v38 }
 0x1cf   : > { %v562_v44 = vadd.f32 1e-05, %v546_v41  ;;  %598 = vperm.xlu1 %987, %v1025_v36   ;;  %v525_v47 = vpop.xlane.xlu0 %524 }
 0x1d0   : > { %v527_v37 = vpop.xlane.xlu1 %526  ;;  %1034 = vrsqrt.f32 %v561_v13  ;;  %v547_v39 = vmul.f32 %v1289_v58, %v525_v47 }
 0x1d1   : > { %v548_v40 = vmul.f32 %v1291_v61, %v527_v37  ;;  %1036 = vrsqrt.f32 %v562_v44 }
 0x1d2   : > { %v1027_v51 = vpop.eup %1026  ;;  %v563_v53 = vadd.f32 1e-05, %v547_v39 }
 0x1d3   : > { %v564_v6 = vadd.f32 1e-05, %v548_v40  ;;  %v1029_v50 = vpop.eup %1028  ;;  %603 = vperm.xlu1 %987, %v1027_v51   ;;  %v529_v42 = vpop.xlane.xlu0 %528 }
 0x1d4   : > { %v531_v54 = vpop.xlane.xlu1 %530  ;;  %1038 = vrsqrt.f32 %v563_v53  ;;  %v549_v45 = vmul.f32 %v1295_v0, %v529_v42  ;;  %608 = vperm.xlu0 %986, %v1029_v50  }
 0x1d5   : > { %v550_v15 = vmul.f32 %v1297_v19, %v531_v54  ;;  %1040 = vrsqrt.f32 %v564_v6 }
 0x1d6   : > { %v1031_v60 = vpop.eup %1030  ;;  %v565_v16 = vadd.f32 1e-05, %v549_v45 }
 0x1d7   : > { %v566_v58 = vadd.f32 1e-05, %v550_v15  ;;  %v1033_v62 = vpop.eup %1032  ;;  %613 = vperm.xlu1 %987, %v1031_v60   ;;  %v533_v61 = vpop.xlane.xlu0 %532 }
 0x1d8   : > { %1042 = vrsqrt.f32 %v565_v16  ;;  %v551_v18 = vmul.f32 %v1301_v22, %v533_v61  ;;  %618 = vperm.xlu0 %986, %v1033_v62  }
 0x1d9   : > { %1044 = vrsqrt.f32 %v566_v58 }
 0x1da   : > { %v1035_v20 = vpop.eup %1034  ;;  %v567_v43 = vadd.f32 1e-05, %v551_v18  ;;  %v535_v57 = vpop.xlane.xlu1 %534 }
 0x1db   : > { %v1037_v46 = vpop.eup %1036  ;;  %v552_v0 = vmul.f32 %v1303_v25, %v535_v57  ;;  %623 = vperm.xlu1 %987, %v1035_v20   ;;  %v537_v19 = vpop.xlane.xlu0 %536 }
 0x1dc   : > { %1046 = vrsqrt.f32 %v567_v43  ;;  %v553_v21 = vmul.f32 %v1307_v28, %v537_v19  ;;  %628 = vperm.xlu0 %986, %v1037_v46  }
 0x1dd   : > { %v568_v23 = vadd.f32 1e-05, %v552_v0 }
 0x1de   : > { %v1039_v24 = vpop.eup %1038  ;;  %v569_v26 = vadd.f32 1e-05, %v553_v21 }
 0x1df   : > { %v1041_v48 = vpop.eup %1040  ;;  %1048 = vrsqrt.f32 %v568_v23  ;;  %633 = vperm.xlu1 %987, %v1039_v24  }
 0x1e0   : > { %1050 = vrsqrt.f32 %v569_v26  ;;  %638 = vperm.xlu0 %986, %v1041_v48  }
 0x1e2   : > { %v1043_v22 = vpop.eup %1042 }
 0x1e3   : > { %v1045_v49 = vpop.eup %1044  ;;  %643 = vperm.xlu1 %987, %v1043_v22  }
 0x1e4   : > { %648 = vperm.xlu0 %986, %v1045_v49  }
 0x1e6   : > { %v1047_v25 = vpop.eup %1046 }
 0x1e7   : > { %653 = vperm.xlu1 %987, %v1047_v25  }
 0x1e9   : > { %v1049_v31 = vpop.eup %1048 }
 0x1ea   : > { %v1051_v1 = vpop.eup %1050  ;;  %658 = vperm.xlu0 %986, %v1049_v31  }
 0x1eb   : > { %663 = vperm.xlu1 %987, %v1051_v1  }
 0x24a   : > { %v589_v28 = vpop.permute.xlu1 %588 }
 0x24b   : > { %v594_v32 = vpop.permute.xlu0 %593  ;;  %v666_v29 = vmul.f32 %v589_v28, %v1324_v63 }
 0x24c   : > { %v667_v35 = vmul.f32 %v594_v32, %v1327_v17 }
 0x24e   : > { %v900_v11 = vpack.c.bf16 %v667_v35, %v666_v29  ;;  %v599_v33 = vpop.permute.xlu1 %598 }
 0x24f   : > { %v668_v55 = vmul.f32 %v599_v33, %v1334_v27 }
 0x250   : > { %901 = vst [vmem:[%s1429_s3] sm:$0xff] %v900_v11  }
 0x252   : > { %v604_v52 = vpop.permute.xlu1 %603 }
 0x253   : > { %v609_v4 = vpop.permute.xlu0 %608  ;;  %v669_v38 = vmul.f32 %v604_v52, %v1337_v2 }
 0x254   : > { %v670_v63 = vmul.f32 %v609_v4, %v1343_v34 }
 0x255   : > { %v905_v41 = vpack.c.bf16 %v669_v38, %v668_v55 }
 0x256   : > { %v614_v36 = vpop.permute.xlu1 %613 }
 0x257   : > { %937 = vst [vmem:[%s1429_s3 + $0x8] sm:$0xff] %v905_v41   ;;  %v619_v17 = vpop.permute.xlu0 %618  ;;  %v671_v13 = vmul.f32 %v614_v36, %v1346_v3 }
 0x258   : > { %v672_v37 = vmul.f32 %v619_v17, %v1353_v56 }
 0x259   : > { %v910_v44 = vpack.c.bf16 %v671_v13, %v670_v63 }
 0x25a   : > { %v624_v47 = vpop.permute.xlu1 %623 }
 0x25b   : > { %938 = vst [vmem:[%s1429_s3 + $0x10] sm:$0xff] %v910_v44   ;;  %v629_v39 = vpop.permute.xlu0 %628  ;;  %v673_v27 = vmul.f32 %v624_v47, %v1356_v5 }
 0x25c   : > { %v674_v51 = vmul.f32 %v629_v39, %v1363_v7 }
 0x25d   : > { %v915_v2 = vpack.c.bf16 %v673_v27, %v672_v37 }
 0x25e   : > { %v634_v40 = vpop.permute.xlu1 %633 }
 0x25f   : > { %939 = vst [vmem:[%s1429_s3 + $0x18] sm:$0xff] %v915_v2   ;;  %v639_v34 = vpop.permute.xlu0 %638  ;;  %v675_v3 = vmul.f32 %v634_v40, %v1366_v8 }
 0x260   : > { %v676_v56 = vmul.f32 %v639_v34, %v1374_v9 }
 0x261   : > { %v920_v53 = vpack.c.bf16 %v675_v3, %v674_v51 }
 0x262   : > { %v644_v6 = vpop.permute.xlu1 %643 }
 0x263   : > { %940 = vst [vmem:[%s1429_s3 + $0x20] sm:$0xff] %v920_v53   ;;  %v677_v50 = vmul.f32 %v644_v6, %v1377_v10  ;;  %v649_v5 = vpop.permute.xlu0 %648 }
 0x264   : > { %v678_v7 = vmul.f32 %v649_v5, %v1386_v30 }
 0x265   : > { %v925_v42 = vpack.c.bf16 %v677_v50, %v676_v56 }
 0x266   : > { %v654_v54 = vpop.permute.xlu1 %653 }
 0x267   : > { %941 = vst [vmem:[%s1429_s3 + $0x28] sm:$0xff] %v925_v42   ;;  %v679_v45 = vmul.f32 %v654_v54, %v1389_v12 }
 0x269   : > { %v930_v8 = vpack.c.bf16 %v679_v45, %v678_v7  ;;  %v659_v15 = vpop.permute.xlu0 %658 }
 0x26a   : > { %v680_v9 = vmul.f32 %v659_v15, %v1399_v14  ;;  %v664_v60 = vpop.permute.xlu1 %663 }
 0x26b   : > { %942 = vst [vmem:[%s1429_s3 + $0x30] sm:$0xff] %v930_v8   ;;  %v681_v10 = vmul.f32 %v664_v60, %v1402_v59 }
 0x26d   : > { %v935_v30 = vpack.c.bf16 %v681_v10, %v680_v9 }
 0x26f   : > { %943 = vst [vmem:[%s1429_s3 + $0x38] sm:$0xff] %v935_v30  }
 0x270   : > { %1065 = shalt.err (!%p1062_p3)
}
 0x271   : > { %s1066_s22 = scalar_lea.hbm %s1457_s8, 1024  ;;  %s1070_s25 = scalar_lea.hbm %s1507_s2, 3072 }
 0x272   : > { %p1067_p4 = scmp.ne.s32.totalorder %s1457_s8, %s1066_s22  ;;  %p1071_p9 = scmp.lt.u32.totalorder %s1457_s8, %s1507_s2 }
 0x273   : > { %p1072_p10 = scmp.lt.u32.totalorder %s1070_s25, %s1066_s22  ;;  %p1074_p12 = scmp.lt.u32.totalorder %s1066_s22, %s1457_s8 }
 0x274   : > { %p1068_p7 = pnand %p1067_p4, %p1173_p5 }
 0x275   : > { %p1073_p11 = por %p1072_p10, %p1071_p9 }
 0x276   : > { %p1069_p8 = pneg %p1068_p7 }
 0x277   : > { %p1075_p13 = por %p1074_p12, %p1073_p11 }
 0x279   : > { %p1076_p0 = pnand %p1075_p13, %p1069_p8 }
 0x27b   : > { %1079 = shalt.err (!%p1076_p0)
}
 0x27c   : > { %s1118_s28 = smov 64   ;;  %s1119_s29 = smov 4  }
 0x27d   : > { %944 = dma.vmem_to_hbm [thread:$0]  (%p1173_p5), %s1459_s5, 1024, %s1457_s8, %s1464_s13, %s1118_s28, %s1118_s28, %s1119_s29  }
 0x27e PF: > { %p950_p1 = scmp.ge.s32.totalorder %s1114_s12, 2  ;;  %s791_s30 = sand.u32 1, %s1102_s9  }
 0x27f   : > { %s792_s3 = scalar_lea.sflag [#allocation3], %s791_s30 }
 0x280   : > { %p947_p2 = pnand %p950_p1, %p1177_p6 }
 0x282   : > { %1097 = dma.done.wait (!%p947_p2), %s792_s3, 1024  }
 0x283   : > { %1099 = vsyncadd (!%p947_p2), %s792_s3, 4294966272  ;;  %p12_p3 = scmp.ge.s32.totalorder %s1160_s15, 5   ;;  %s1510_s9 = smov %s1106_s10 }
 0x284   : > { %s1511_s10 = smov %s1110_s11  ;;  %s1512_s11 = smov %s1171_s18 }
 0x285   : > { %s1513_s12 = smov %s1160_s15  ;;  %14 = sbr.rel (!%p12_p3) target bundleno = 3 (0x3), region = 66 }
 0x28c   :  { %797 = vsyncpa [#allocation3], 1 }
 0x28d   :  { %799 = vsyncpa [#allocation3 + $0x1], 1 }

</bundles_post_ra>
